<compile_context>
chip_gen: v7x
topology: tpu7x:2x2x1
jax: 0.10.0
libtpu: 0.0.40
codegen_flags: <defaults>
</compile_context>

<pallas_src>
import functools

import numpy as np
import jax
import jax.numpy as jnp
from jax.experimental import pallas as pl
from jax.experimental.pallas import tpu as pltpu

EPS = 1e-5


# ----------------------------------------------------------------------------------
# AdaIN kernel
# ----------------------------------------------------------------------------------
def _adain_row_kernel(x_ref, sstd_ref, smean_ref, o_ref, *, hw_true):
    # x_ref:     (TR, HW)  rows = flattened (batch, channel), lanes = true spatial
    # sstd_ref:  (TR, 1)   per-row style std  (precomputed outside the kernel)
    # smean_ref: (TR, 1)   per-row style mean (precomputed outside the kernel)
    xf = x_ref[...].astype(jnp.float32)
    inv_n = 1.0 / hw_true
    # unbiased variance (ddof=1) to match torch.var; N==1 -> NaN, like torch
    inv_nm1 = (1.0 / (hw_true - 1)) if hw_true > 1 else float("nan")

    c_mean = jnp.sum(xf, axis=-1, keepdims=True) * inv_n                 # (TR, 1)
    diff = xf - c_mean
    c_var = jnp.sum(diff * diff, axis=-1, keepdims=True) * inv_nm1       # (TR, 1)

    # fold the whole normalization into one per-row affine; rsqrt -> EUP slot
    scale = sstd_ref[...] * jax.lax.rsqrt(c_var + EPS)                   # (TR, 1)
    bias = smean_ref[...] - scale * c_mean                               # (TR, 1)

    # f32 math (free under DMA slack; avoids bf16 rounding of scale/bias), cast at store
    o_ref[...] = (scale * xf + bias).astype(o_ref.dtype)


def adain(x, y, *, row_tile=None):
    """AdaIN. x: (B, C, H, W) NCHW content, y: (B, D) style features -> (B, C, H, W)."""
    B, C, H, W = x.shape
    hw = H * W
    rows = B * C

    # Style stats are O(B*D): compute in plain JAX and broadcast per row.
    yf = y.astype(jnp.float32)
    s_mean = jnp.mean(yf, axis=1)                                        # (B,)
    s_var = jnp.var(yf, axis=1, ddof=1)                                  # unbiased
    s_std = jnp.sqrt(s_var + EPS)
    s_std_rows = jnp.repeat(s_std, C).reshape(rows, 1)                   # (B*C, 1)
    s_mean_rows = jnp.repeat(s_mean, C).reshape(rows, 1)

    x_rows = x.reshape(rows, hw)                                         # no padding pass

    itemsize = jnp.dtype(x.dtype).itemsize
    if row_tile is None:
        budget = 2 * 1024 * 1024                       # ~2 MiB per input tile, dtype-aware
        vmem_rows = max(8, (budget // (hw * itemsize)) // 8 * 8)
        grid_rows = max(8, (rows // 4) // 8 * 8)       # aim for >=4 grid steps
        row_tile = min(vmem_rows, grid_rows)
        if rows < 8:                                   # tiny case: block dim == full dim
            row_tile = rows
    grid = pl.cdiv(rows, row_tile)                     # ragged tail handled by masking

    tile_bytes = row_tile * hw * itemsize
    # double-buffered in+out ~= 4x tile; keep the limit well under v7x's 64 MiB physical
    vmem_limit = int(min(60 * 1024 * 1024, max(32 * 1024 * 1024, 6 * tile_bytes)))

    cost = pl.CostEstimate(
        flops=5 * rows * hw,
        transcendentals=rows,
        bytes_accessed=2 * rows * hw * itemsize + 2 * rows * 4,
    )

    out = pl.pallas_call(
        functools.partial(_adain_row_kernel, hw_true=hw),
        out_shape=jax.ShapeDtypeStruct((rows, hw), x.dtype),
        grid_spec=pltpu.PrefetchScalarGridSpec(
            num_scalar_prefetch=0,
            grid=(grid,),
            in_specs=[
                pl.BlockSpec((row_tile, hw), lambda r: (r, 0)),
                pl.BlockSpec((row_tile, 1), lambda r: (r, 0)),
                pl.BlockSpec((row_tile, 1), lambda r: (r, 0)),
            ],
            out_specs=pl.BlockSpec((row_tile, hw), lambda r: (r, 0)),
        ),
        compiler_params=pltpu.CompilerParams(
            dimension_semantics=("parallel",),         # row tiles shard across TCs (v7x)
            vmem_limit_bytes=vmem_limit,
        ),
        cost_estimate=cost,
    )(x_rows, s_std_rows.astype(jnp.float32), s_mean_rows.astype(jnp.float32))

    return out.reshape(B, C, H, W)


def adain_ref(x, y):
    """Pure-JAX reference (unbiased variance, matches the torch module)."""
    c_mean = jnp.mean(x, axis=(2, 3), keepdims=True)
    c_var = jnp.var(x, axis=(2, 3), keepdims=True, ddof=1)
    s_mean = jnp.mean(y, axis=1)[:, None, None, None]
    s_var = jnp.var(y, axis=1, ddof=1)[:, None, None, None]
    return jnp.sqrt(s_var + EPS) * (x - c_mean) / jnp.sqrt(c_var + EPS) + s_mean


# ----------------------------------------------------------------------------------
# FeatureNet tail: fused ResBlock(160) x 3 kernel
# ----------------------------------------------------------------------------------
def _resblock_stack_kernel(x_ref, g_ref, w_ref, scale_ref, bias_ref, o_ref, *, n_blocks):
    # x_ref:     (M, C)   NHWC-flattened activation rows (M = batch_tile*H*W)
    # g_ref:     (9, M, M) bf16 one-hot gather matrices: reflect-padded 3x3 tap t == G[t] @ x
    # w_ref:     (n_blocks, 9, C, C) bf16 conv weights, (tap, Cin, Cout)
    # scale_ref: (n_blocks, 1, C) f32 folded BatchNorm scale
    # bias_ref:  (n_blocks, 1, C) f32 folded conv-bias + BatchNorm bias
    x = x_ref[...].astype(jnp.float32)
    for blk in range(n_blocks):
        xb = x.astype(jnp.bfloat16)
        acc = None
        for t in range(9):
            if t == 4:                          # centre tap: gather matrix is the identity
                tap = xb
            else:                               # gather-as-matmul: exact one-hot selection
                tap = jnp.dot(g_ref[t], xb,
                              preferred_element_type=jnp.float32).astype(jnp.bfloat16)
            contrib = jnp.dot(tap, w_ref[blk, t], preferred_element_type=jnp.float32)
            acc = contrib if acc is None else acc + contrib
        y = acc * scale_ref[blk] + bias_ref[blk]        # folded eval-mode BatchNorm
        x = jnp.maximum(y, 0.0) + x                     # ReLU + residual, carried in f32
    o_ref[...] = x.astype(o_ref.dtype)


def _reflect_gather_matrices(batch_tile, H, W):
    """(9, M, M) one-hot matrices so that G[3*dy+dx] @ x gathers the reflect-padded
    3x3 neighbourhood tap (dy, dx) of an NHWC-flattened (M, C) activation.
    Built with numpy -> constant-folded at trace time (zero runtime cost)."""
    def refl(v, n):
        return 1 if v < 0 else (n - 2 if v >= n else v)
    M = batch_tile * H * W
    g = np.zeros((9, M, M), np.float32)
    for b in range(batch_tile):
        for i in range(H):
            for j in range(W):
                r = (b * H + i) * W + j
                for dy in range(3):
                    for dx in range(3):
                        s = (b * H + refl(i + dy - 1, H)) * W + refl(j + dx - 1, W)
                        g[3 * dy + dx, r, s] = 1.0
    return g


def prepare_resblock_params(params_list, *, eps=1e-5):
    """One-time parameter packing (hoisted out of the hot path): conv weights to
    (n_blocks, 9, Cin, Cout) bf16 tap-major, eval-mode BatchNorm folded into one
    per-channel scale/bias affine."""
    w_all, scale_all, bias_all = [], [], []
    for (w, conv_b, gamma, beta, rm, rv) in params_list:
        C = w.shape[0]
        # torch conv weight is (Cout, Cin, kh, kw) -> (kh, kw, Cin, Cout) -> (9, Cin, Cout)
        w_taps = jnp.transpose(w, (2, 3, 1, 0)).reshape(9, C, C)
        s = gamma * jax.lax.rsqrt(rv + eps)
        b = beta + s * (conv_b - rm)
        w_all.append(w_taps)
        scale_all.append(s)
        bias_all.append(b)
    n = len(params_list)
    w_packed = jnp.stack(w_all).astype(jnp.bfloat16)                     # (n, 9, C, C)
    scale_packed = jnp.stack(scale_all).astype(jnp.float32).reshape(n, 1, -1)
    bias_packed = jnp.stack(bias_all).astype(jnp.float32).reshape(n, 1, -1)
    return w_packed, scale_packed, bias_packed


def resblock_stack(x, packed_params, *, batch_tile=None):
    """FeatureNet.block: three chained ResBlock(160)s fused into a single pallas_call.
    Each ResBlock = ReflectionPad2d(1) + Conv2d(3x3) + BatchNorm2d(eval) + ReLU + skip."""
    w_packed, scale_packed, bias_packed = packed_params
    n_blocks = w_packed.shape[0]
    B, C, H, W = x.shape
    assert H >= 2 and W >= 2, "ReflectionPad2d(1) needs spatial dims >= 2"
    HW = H * W

    if batch_tile is None:
        # batch_tile must divide B (no partial blocks: the gather matmul must never see
        # uninitialised rows); keep M modest and prefer >=2 grid steps (2 TCs on v7x).
        cands = [bt for bt in range(1, B + 1) if B % bt == 0 and bt * HW <= 512]
        multi = [bt for bt in cands if B // bt >= 2]
        batch_tile = max(multi) if multi else (max(cands) if cands else 1)
    assert B % batch_tile == 0
    M = batch_tile * HW

    # layout plumbing hoisted out of the kernel: NCHW -> NHWC rows, once per forward
    x_rows = jnp.transpose(x, (0, 2, 3, 1)).reshape(B * HW, C)
    g = jnp.asarray(_reflect_gather_matrices(batch_tile, H, W), dtype=jnp.bfloat16)

    itemsize = jnp.dtype(x.dtype).itemsize
    cost = pl.CostEstimate(
        flops=int(2 * n_blocks * 9 * B * HW * (M + C) * C),
        transcendentals=0,
        bytes_accessed=int(2 * B * HW * C * itemsize + g.size * 2 + w_packed.size * 2),
    )

    out = pl.pallas_call(
        functools.partial(_resblock_stack_kernel, n_blocks=int(n_blocks)),
        out_shape=jax.ShapeDtypeStruct((B * HW, C), x.dtype),
        grid_spec=pltpu.PrefetchScalarGridSpec(
            num_scalar_prefetch=0,
            grid=(B // batch_tile,),
            in_specs=[
                pl.BlockSpec((M, C), lambda b: (b, 0)),
                pl.BlockSpec((9, M, M), lambda b: (0, 0, 0)),
                pl.BlockSpec(tuple(w_packed.shape), lambda b: (0, 0, 0, 0)),
                pl.BlockSpec(tuple(scale_packed.shape), lambda b: (0, 0, 0)),
                pl.BlockSpec(tuple(bias_packed.shape), lambda b: (0, 0, 0)),
            ],
            out_specs=pl.BlockSpec((M, C), lambda b: (b, 0)),
        ),
        compiler_params=pltpu.CompilerParams(
            dimension_semantics=("parallel",),          # image tiles are independent
            vmem_limit_bytes=32 * 1024 * 1024,          # safe on v5e/v6e/v7x
        ),
        cost_estimate=cost,
    )(x_rows, g, w_packed, scale_packed, bias_packed)

    return jnp.transpose(out.reshape(B, H, W, C), (0, 3, 1, 2))


def resblock_ref(x, params, *, eps=1e-5):
    """Independent pure-JAX reference (lax conv) for one ResBlock, eval-mode BN."""
    w, conv_b, gamma, beta, rm, rv = params
    xp = jnp.pad(x, ((0, 0), (0, 0), (1, 1), (1, 1)), mode="reflect")
    conv = jax.lax.conv_general_dilated(
        xp.astype(jnp.bfloat16), w.astype(jnp.bfloat16),
        window_strides=(1, 1), padding="VALID",
        dimension_numbers=("NCHW", "OIHW", "NCHW"),
        preferred_element_type=jnp.float32,
    ) + conv_b[None, :, None, None]
    y = (conv - rm[None, :, None, None]) * (gamma / jnp.sqrt(rv + eps))[None, :, None, None]
    y = y + beta[None, :, None, None]
    return jnp.maximum(y, 0.0) + x


# ----------------------------------------------------------------------------------
if __name__ == "__main__":
    key = jax.random.PRNGKey(0)
    k = jax.random.split(key, 8)

    adain_jit = jax.jit(adain)

    # --- AdaIN, lane-dense case (H*W = 256) ---
    B, C, H, W, D = 2, 4, 16, 16, 32
    x = jax.random.normal(k[0], (B, C, H, W), dtype=jnp.float32)
    y = jax.random.normal(k[1], (B, D), dtype=jnp.float32)
    out = jax.block_until_ready(adain_jit(x, y))
    assert out.shape == (B, C, H, W)
    assert jnp.allclose(out, adain_ref(x, y), atol=1e-4, rtol=1e-4), "AdaIN mismatch"

    # --- AdaIN, ragged case: H*W=100 (not a multiple of 128), rows=10 (partial tile) ---
    x2 = jax.random.normal(k[2], (2, 5, 10, 10), dtype=jnp.float32)
    y2 = jax.random.normal(k[3], (2, 16), dtype=jnp.float32)
    out2 = jax.block_until_ready(adain_jit(x2, y2))
    assert jnp.allclose(out2, adain_ref(x2, y2), atol=1e-4, rtol=1e-4), "AdaIN ragged mismatch"

    # --- FeatureNet tail: ResBlock(160) x 3, fused ---
    Cr, Hr, Wr = 160, 8, 8
    xr = jax.random.normal(k[4], (B, Cr, Hr, Wr), dtype=jnp.float32)
    params_list = []
    for i in range(3):
        kk = jax.random.split(k[5 + i], 6)
        params_list.append((
            0.05 * jax.random.normal(kk[0], (Cr, Cr, 3, 3), jnp.float32),   # conv weight
            0.05 * jax.random.normal(kk[1], (Cr,), jnp.float32),            # conv bias
            1.0 + 0.1 * jax.random.normal(kk[2], (Cr,), jnp.float32),       # BN gamma
            0.1 * jax.random.normal(kk[3], (Cr,), jnp.float32),             # BN beta
            0.1 * jax.random.normal(kk[4], (Cr,), jnp.float32),             # BN running_mean
            jax.random.uniform(kk[5], (Cr,), jnp.float32, 0.5, 1.5),        # BN running_var
        ))
    packed = prepare_resblock_params(params_list)                  # hoisted, once
    out_r = jax.block_until_ready(jax.jit(resblock_stack)(xr, packed))
    ref_r = xr
    for p in params_list:
        ref_r = resblock_ref(ref_r, p)
    assert out_r.shape == (B, Cr, Hr, Wr)
    assert jnp.allclose(out_r, ref_r, atol=2e-2, rtol=2e-2), "ResBlock mismatch"

    print("KERNEL_OK")
</pallas_src>

<mosaic_0001>
module attributes {stable_mosaic.version = 11 : i64} {
  func.func @_adain_row_kernel(%arg0: i32, %arg1: memref<8x256xf32, #tpu.memory_space<vmem>>, %arg2: memref<8x1xf32, #tpu.memory_space<vmem>>, %arg3: memref<8x1xf32, #tpu.memory_space<vmem>>, %arg4: memref<8x256xf32, #tpu.memory_space<vmem>>) attributes {dimension_semantics = [#tpu.dimension_semantics<parallel>], iteration_bounds = array<i64: 1>, scalar_prefetch = 0 : i64, scratch_operands = 0 : i64, tpu.core_type = #tpu.core_type<tc>, window_params = [{transform_indices = @transform_0, window_bounds = array<i64: 8, 256>}, {transform_indices = @transform_1, window_bounds = array<i64: 8, 1>}, {transform_indices = @transform_2, window_bounds = array<i64: 8, 1>}, {transform_indices = @transform_3, window_bounds = array<i64: 8, 256>}]} {
    %c0 = arith.constant 0 : index
    %c0_0 = arith.constant 0 : index
    %0 = vector.load %arg1[%c0, %c0_0] : memref<8x256xf32, #tpu.memory_space<vmem>>, vector<8x256xf32>
    %cst = arith.constant dense<0.000000e+00> : vector<8xf32>
    %1 = vector.multi_reduction <add>, %0, %cst [1] : vector<8x256xf32> to vector<8xf32>
    %2 = vector.shape_cast %1 : vector<8xf32> to vector<8x1xf32>
    %cst_1 = arith.constant 3.906250e-03 : f32
    %3 = vector.broadcast %cst_1 : f32 to vector<8x1xf32>
    %4 = arith.mulf %2, %3 : vector<8x1xf32>
    %5 = vector.broadcast %4 : vector<8x1xf32> to vector<8x256xf32>
    %6 = arith.subf %0, %5 : vector<8x256xf32>
    %7 = arith.mulf %6, %6 : vector<8x256xf32>
    %cst_2 = arith.constant dense<0.000000e+00> : vector<8xf32>
    %8 = vector.multi_reduction <add>, %7, %cst_2 [1] : vector<8x256xf32> to vector<8xf32>
    %9 = vector.shape_cast %8 : vector<8xf32> to vector<8x1xf32>
    %cst_3 = arith.constant 0.00392156886 : f32
    %10 = vector.broadcast %cst_3 : f32 to vector<8x1xf32>
    %11 = arith.mulf %9, %10 : vector<8x1xf32>
    %c0_4 = arith.constant 0 : index
    %c0_5 = arith.constant 0 : index
    %12 = vector.load %arg2[%c0_4, %c0_5] : memref<8x1xf32, #tpu.memory_space<vmem>>, vector<8x1xf32>
    %cst_6 = arith.constant 9.99999974E-6 : f32
    %13 = vector.broadcast %cst_6 : f32 to vector<8x1xf32>
    %14 = arith.addf %11, %13 : vector<8x1xf32>
    %15 = math.rsqrt %14 : vector<8x1xf32>
    %16 = arith.mulf %12, %15 : vector<8x1xf32>
    %c0_7 = arith.constant 0 : index
    %c0_8 = arith.constant 0 : index
    %17 = vector.load %arg3[%c0_7, %c0_8] : memref<8x1xf32, #tpu.memory_space<vmem>>, vector<8x1xf32>
    %18 = arith.mulf %16, %4 : vector<8x1xf32>
    %19 = arith.subf %17, %18 : vector<8x1xf32>
    %20 = vector.broadcast %16 : vector<8x1xf32> to vector<8x256xf32>
    %21 = arith.mulf %20, %0 : vector<8x256xf32>
    %22 = vector.broadcast %19 : vector<8x1xf32> to vector<8x256xf32>
    %23 = arith.addf %21, %22 : vector<8x256xf32>
    %c0_9 = arith.constant 0 : index
    %c0_10 = arith.constant 0 : index
    %24 = vector.load %arg4[%c0_9, %c0_10] : memref<8x256xf32, #tpu.memory_space<vmem>>, vector<8x256xf32>
    tpu.vector_store %arg4[%c0_9, %c0_10], %23 {strides = array<i32>} : memref<8x256xf32, #tpu.memory_space<vmem>>, vector<8x256xf32>,
    return
  }
  func.func @transform_0(%arg0: i32) -> (i32, i32) {
    %c0_i32 = arith.constant 0 : i32
    %c0_i32_0 = arith.constant 0 : i32
    return %arg0, %c0_i32 : i32, i32
  }
  func.func @transform_1(%arg0: i32) -> (i32, i32) {
    %c0_i32 = arith.constant 0 : i32
    %c0_i32_0 = arith.constant 0 : i32
    return %arg0, %c0_i32 : i32, i32
  }
  func.func @transform_2(%arg0: i32) -> (i32, i32) {
    %c0_i32 = arith.constant 0 : i32
    %c0_i32_0 = arith.constant 0 : i32
    return %arg0, %c0_i32 : i32, i32
  }
  func.func @transform_3(%arg0: i32) -> (i32, i32) {
    %c0_i32 = arith.constant 0 : i32
    %c0_i32_0 = arith.constant 0 : i32
    return %arg0, %c0_i32 : i32, i32
  }
}

</mosaic_0001>

<bundles_post_ra>
// kernel: adain.1
= control target key start
LH: loop header
LB: loop body
LE: loop exit
PB: predicated region body
PF: predicated region fallthrough
CT: control target
= control target key end

     0   :  { %v60_v10 = vmov 0   ;;  %s99_s0 = inlined_call_operand.vmem [shape: f32[8,256], index: 0, kind: input, shape index: {}]   ;;  %s100_s1 = inlined_call_operand.vmem [shape: f32[8,1], index: 1, kind: input, shape index: {}]   ;;  %s101_s2 = inlined_call_operand.vmem [shape: f32[8,1], index: 2, kind: input, shape index: {}]   ;;  %s102_s3 = inlined_call_operand.vmem [shape: f32[8,256], index: 3, kind: output, shape index: {}]  }
   0x1   :  { %v14_v0 = vld [vmem:[%s99_s0] sm:$0xff]  ;;  %v15_v1 = vld [vmem:[%s99_s0 + $0x8] sm:$0xff]  ;;  %56 = vset.pattern.permute.xlu1 %v60_v10  ;;  %57 = vset.pattern.permute.xlu0 %v60_v10 }
   0x2   :  { %v16_v2 = vadd.f32 %v15_v1, %v14_v0  ;;  %v28_v14 = vld [vmem:[%s100_s1] sm:$0xff] }
   0x3   :  { %v32_v17 = vld [vmem:[%s101_s2] sm:$0xff] }
   0x4   :  { %17 = vadd.xlane.f32.xlu0 %v16_v2 }
  0x91   :  { %v18_v3 = vpop.xlane.xlu0 %17 }
  0x92   :  { %v19_v4 = vmul.f32 0.00390625, %v18_v3 }
  0x94   :  { %v20_v5 = vsub.f32 %v14_v0, %v19_v4  ;;  %v21_v6 = vsub.f32 %v15_v1, %v19_v4 }
  0x96   :  { %v22_v7 = vmul.f32 %v20_v5, %v20_v5  ;;  %v23_v8 = vmul.f32 %v21_v6, %v21_v6 }
  0x98   :  { %v24_v9 = vadd.f32 %v23_v8, %v22_v7 }
  0x9a   :  { %25 = vadd.xlane.f32.xlu0 %v24_v9 }
 0x127   :  { %v26_v11 = vpop.xlane.xlu0 %25 }
 0x128   :  { %v27_v12 = vmul.f32 0.003921569, %v26_v11 }
 0x12a   :  { %v29_v13 = vadd.f32 1e-05, %v27_v12 }
 0x12c   :  { %58 = vrsqrt.f32 %v29_v13 }
 0x136   :  { %v59_v15 = vpop.eup %58 }
 0x137   :  { %v31_v16 = vmul.f32 %v59_v15, %v28_v14 }
 0x139   :  { %37 = vperm.xlu1 %56, %v31_v16   ;;  %v33_v18 = vmul.f32 %v31_v16, %v19_v4 }
 0x13b   :  { %v34_v19 = vsub.f32 %v32_v17, %v33_v18 }
 0x13d   :  { %44 = vperm.xlu1 %56, %v34_v19  }
 0x1b8   :  { %v38_v20 = vpop.permute.xlu1 %37 }
 0x1b9   :  { %v40_v21 = vmul.f32 %v38_v20, %v14_v0  ;;  %v41_v22 = vmul.f32 %v38_v20, %v15_v1 }
 0x1bc   :  { %v45_v23 = vpop.permute.xlu1 %44 }
 0x1bd   :  { %v47_v24 = vadd.f32 %v45_v23, %v40_v21  ;;  %v48_v25 = vadd.f32 %v45_v23, %v41_v22 }
 0x1bf   :  { %49 = vst [vmem:[%s102_s3] sm:$0xff] %v47_v24  ;;  %50 = vst [vmem:[%s102_s3 + $0x8] sm:$0xff] %v48_v25 }

</bundles_post_ra>
